<compile_context>
chip_gen: v6e
topology: v6e:2x2x1
jax: 0.10.0
libtpu: 0.0.40
codegen_flags: <defaults>
</compile_context>

<pallas_src>
import functools

import jax
import jax.numpy as jnp
from jax.experimental import pallas as pl
from jax.experimental.pallas import tpu as pltpu

STATE_SIZE = 33
ACTION_SIZE = 4
FC1 = 256
FC2 = 128

TILE_B_DEFAULT = 1024   # multiple of 256; working set << 64 MiB even on v7x


def _round_up(x, m):
    return ((x + m - 1) // m) * m


def critic_kernel(s_ref, a_ref, w1_ref, b1_ref, w2s_ref, w2a_ref, b2_ref,
                  w3_ref, b3_ref, o_ref):
    # ---- fc1 + relu (MXU, bf16 operands, f32 accumulation) ----
    s_bf = s_ref[...].astype(jnp.bfloat16)
    h1 = jnp.dot(s_bf, w1_ref[...], preferred_element_type=jnp.float32)
    h1 = jnp.maximum(h1 + b1_ref[...], 0.0)

    # ---- fc2 on concat([h1, action]) as a split matmul ----
    # State-hidden part (K=256) on the MXU in bf16.
    acc = jnp.dot(h1.astype(jnp.bfloat16), w2s_ref[...],
                  preferred_element_type=jnp.float32)
    # Action part (K=4): broadcast MACs on the VPU in f32 — avoids a
    # nearly-empty MXU contraction pass.
    a = a_ref[...]
    w2a = w2a_ref[...]
    for k in range(ACTION_SIZE):
        acc = acc + a[:, k:k + 1] * w2a[k:k + 1, :]
    h2 = jnp.maximum(acc + b2_ref[...], 0.0)

    # ---- fc3 (N=1): VPU multiply + lane reduce instead of an MXU pass ----
    q = jnp.sum(h2 * w3_ref[...], axis=-1, keepdims=True) + b3_ref[0, 0]
    o_ref[...] = q


@functools.partial(jax.jit, static_argnames=("tile_b",))
def critic_forward(state, action, params, *, tile_b=TILE_B_DEFAULT):
    """state: (B, 33) f32, action: (B, 4) f32 -> (B, 1) f32."""
    B = state.shape[0]
    w1t, b1, w2t, b2, w3t, b3 = params

    # Shrink the tile for small batches (block rows must be a multiple of 8).
    tb = min(tile_b, _round_up(B, 8))
    grid = (pl.cdiv(B, tb),)

    # Weights used on the MXU are cast to bf16 once, outside the kernel.
    w1_bf = w1t.astype(jnp.bfloat16)                  # (33, 256)   bf16
    w2s_bf = w2t[:FC1, :].astype(jnp.bfloat16)        # (256, 128)  bf16
    w2a = w2t[FC1:, :]                                # (4, 128)    f32 (VPU)
    w3_row = w3t.reshape(1, FC2)                      # (1, 128)    f32 (VPU)

    inputs = (
        state,                     # (B, 33)
        action,                    # (B, 4)
        w1_bf,                     # (33, 256)
        b1.reshape(1, FC1),        # (1, 256)
        w2s_bf,                    # (256, 128)
        w2a,                       # (4, 128)
        b2.reshape(1, FC2),        # (1, 128)
        w3_row,                    # (1, 128)
        b3.reshape(1, 1),          # (1, 1) scalar -> SMEM
    )

    def batch_spec(width):
        return pl.BlockSpec((tb, width), lambda i: (i, 0))

    def const_spec(shape):
        # Constant index_map -> fetched once, stays VMEM-resident over the grid.
        return pl.BlockSpec(shape, lambda i: (0, 0))

    in_specs = [
        batch_spec(STATE_SIZE),
        batch_spec(ACTION_SIZE),
        const_spec((STATE_SIZE, FC1)),
        const_spec((1, FC1)),
        const_spec((FC1, FC2)),
        const_spec((ACTION_SIZE, FC2)),
        const_spec((1, FC2)),
        const_spec((1, FC2)),
        pl.BlockSpec(memory_space=pltpu.MemorySpace.SMEM),   # b3 scalar
    ]
    out_specs = pl.BlockSpec((tb, 1), lambda i: (i, 0))

    return pl.pallas_call(
        critic_kernel,
        out_shape=jax.ShapeDtypeStruct((B, 1), jnp.float32),
        grid=grid,
        in_specs=in_specs,
        out_specs=out_specs,
        compiler_params=pltpu.CompilerParams(
            dimension_semantics=("parallel",),    # megacore shard the batch
            vmem_limit_bytes=64 << 20,
        ),
    )(*inputs)


def init_params(key):
    """Deterministic init mirroring Critic.reset_parameters().

    PyTorch: fc.weight is (out, in); bounds use weight.size()[0] == out_features.
    We store weights already transposed as (in, out).
    """
    k1, k2, k3, k4, k5, k6 = jax.random.split(key, 6)
    f1 = 1.0 / jnp.sqrt(jnp.float32(FC1))
    f2 = 1.0 / jnp.sqrt(jnp.float32(FC2))
    f3 = 0.003

    w1t = jax.random.uniform(k1, (STATE_SIZE, FC1), jnp.float32, -f1, f1)
    b1 = jax.random.uniform(k2, (FC1,), jnp.float32, -f1, f1)
    w2t = jax.random.uniform(k3, (FC1 + ACTION_SIZE, FC2), jnp.float32, -f2, f2)
    b2 = jax.random.uniform(k4, (FC2,), jnp.float32, -f2, f2)
    w3t = jax.random.uniform(k5, (FC2, 1), jnp.float32, -f3, f3)
    b3 = jax.random.uniform(k6, (1,), jnp.float32, -f3, f3)
    return (w1t, b1, w2t, b2, w3t, b3)


def reference_forward(state, action, params):
    """Pure-JAX f32 reference matching the PyTorch module."""
    w1t, b1, w2t, b2, w3t, b3 = params
    h1 = jax.nn.relu(state @ w1t + b1)
    x = jnp.concatenate([h1, action], axis=1)
    h2 = jax.nn.relu(x @ w2t + b2)
    return h2 @ w3t + b3


if __name__ == "__main__":
    key = jax.random.PRNGKey(0)
    kp, ks, ka = jax.random.split(key, 3)
    params = init_params(kp)

    # Small shapes consistent with the module (state=33, action=4).
    B = 8
    state = jax.random.normal(ks, (B, STATE_SIZE), jnp.float32)
    action = jax.random.normal(ka, (B, ACTION_SIZE), jnp.float32)

    q = critic_forward(state, action, params)
    q = jax.block_until_ready(q)
    q_ref = reference_forward(state, action, params)
    assert q.shape == (B, 1)
    # bf16 MXU operands -> slightly looser tolerance than pure f32.
    assert jnp.allclose(q, q_ref, atol=5e-3, rtol=2e-2), (q, q_ref)

    # Exercise the batch grid + partial last tile (rows are independent, so
    # the padded tail of the final block is harmless).
    B2 = 200
    ks2, ka2 = jax.random.split(jax.random.PRNGKey(1))
    state2 = jax.random.normal(ks2, (B2, STATE_SIZE), jnp.float32)
    action2 = jax.random.normal(ka2, (B2, ACTION_SIZE), jnp.float32)
    q2 = jax.block_until_ready(critic_forward(state2, action2, params, tile_b=128))
    q2_ref = reference_forward(state2, action2, params)
    assert q2.shape == (B2, 1)
    assert jnp.allclose(q2, q2_ref, atol=5e-3, rtol=2e-2), (q2, q2_ref)

    print("KERNEL_OK")
</pallas_src>

<mosaic_0001>
module attributes {stable_mosaic.version = 11 : i64} {
  func.func @critic_kernel(%arg0: i32, %arg1: memref<8x33xf32, #tpu.memory_space<vmem>>, %arg2: memref<8x4xf32, #tpu.memory_space<vmem>>, %arg3: memref<33x256xbf16, #tpu.memory_space<vmem>>, %arg4: memref<1x256xf32, #tpu.memory_space<vmem>>, %arg5: memref<256x128xbf16, #tpu.memory_space<vmem>>, %arg6: memref<4x128xf32, #tpu.memory_space<vmem>>, %arg7: memref<1x128xf32, #tpu.memory_space<vmem>>, %arg8: memref<1x128xf32, #tpu.memory_space<vmem>>, %arg9: memref<1x1xf32, #tpu.memory_space<smem>>, %arg10: memref<8x1xf32, #tpu.memory_space<vmem>>) attributes {dimension_semantics = [#tpu.dimension_semantics<parallel>], iteration_bounds = array<i64: 1>, scalar_prefetch = 0 : i64, scratch_operands = 0 : i64, tpu.core_type = #tpu.core_type<tc>, window_params = [{transform_indices = @transform_0, window_bounds = array<i64: 8, 33>}, {transform_indices = @transform_1, window_bounds = array<i64: 8, 4>}, {pipeline_mode = #tpu.pipeline_mode<synchronous>, transform_indices = @transform_2, window_bounds = array<i64: 33, 256>}, {pipeline_mode = #tpu.pipeline_mode<synchronous>, transform_indices = @transform_3, window_bounds = array<i64: 1, 256>}, {pipeline_mode = #tpu.pipeline_mode<synchronous>, transform_indices = @transform_4, window_bounds = array<i64: 256, 128>}, {pipeline_mode = #tpu.pipeline_mode<synchronous>, transform_indices = @transform_5, window_bounds = array<i64: 4, 128>}, {pipeline_mode = #tpu.pipeline_mode<synchronous>, transform_indices = @transform_6, window_bounds = array<i64: 1, 128>}, {pipeline_mode = #tpu.pipeline_mode<synchronous>, transform_indices = @transform_7, window_bounds = array<i64: 1, 128>}, {transform_indices = @transform_8, window_bounds = array<i64: 1, 1>}, {transform_indices = @transform_9, window_bounds = array<i64: 8, 1>}]} {
    %c0 = arith.constant 0 : index
    %c0_0 = arith.constant 0 : index
    %0 = vector.load %arg1[%c0, %c0_0] : memref<8x33xf32, #tpu.memory_space<vmem>>, vector<8x33xf32>
    %1 = arith.truncf %0 : vector<8x33xf32> to vector<8x33xbf16>
    %c0_1 = arith.constant 0 : index
    %c0_2 = arith.constant 0 : index
    %2 = vector.load %arg3[%c0_1, %c0_2] : memref<33x256xbf16, #tpu.memory_space<vmem>>, vector<33x256xbf16>
    %cst = arith.constant dense<0.000000e+00> : vector<8x256xf32>
    %3 = tpu.matmul %1, %2, %cst {dimension_numbers = #tpu.dot_dimension_numbers<[1], [0], [0], [1], [0, 0, 1, 1], [], []>} : vector<8x33xbf16>, vector<33x256xbf16>, vector<8x256xf32> -> vector<8x256xf32>
    %c0_3 = arith.constant 0 : index
    %c0_4 = arith.constant 0 : index
    %4 = vector.load %arg4[%c0_3, %c0_4] : memref<1x256xf32, #tpu.memory_space<vmem>>, vector<1x256xf32>
    %5 = vector.broadcast %4 : vector<1x256xf32> to vector<8x256xf32>
    %6 = arith.addf %3, %5 : vector<8x256xf32>
    %cst_5 = arith.constant 0.000000e+00 : f32
    %7 = vector.broadcast %cst_5 : f32 to vector<8x256xf32>
    %8 = arith.maximumf %6, %7 : vector<8x256xf32>
    %9 = arith.truncf %8 : vector<8x256xf32> to vector<8x256xbf16>
    %c0_6 = arith.constant 0 : index
    %c0_7 = arith.constant 0 : index
    %10 = vector.load %arg5[%c0_6, %c0_7] : memref<256x128xbf16, #tpu.memory_space<vmem>>, vector<256x128xbf16>
    %cst_8 = arith.constant dense<0.000000e+00> : vector<8x128xf32>
    %11 = tpu.matmul %9, %10, %cst_8 {dimension_numbers = #tpu.dot_dimension_numbers<[1], [0], [0], [1], [0, 0, 1, 1], [], []>} : vector<8x256xbf16>, vector<256x128xbf16>, vector<8x128xf32> -> vector<8x128xf32>
    %c0_9 = arith.constant 0 : index
    %c0_10 = arith.constant 0 : index
    %12 = vector.load %arg2[%c0_9, %c0_10] : memref<8x4xf32, #tpu.memory_space<vmem>>, vector<8x4xf32>
    %c0_11 = arith.constant 0 : index
    %c0_12 = arith.constant 0 : index
    %13 = vector.load %arg6[%c0_11, %c0_12] : memref<4x128xf32, #tpu.memory_space<vmem>>, vector<4x128xf32>
    %14 = vector.extract_strided_slice %12 {offsets = [0, 0], sizes = [8, 1], strides = [1, 1]} : vector<8x4xf32> to vector<8x1xf32>
    %15 = vector.extract_strided_slice %13 {offsets = [0, 0], sizes = [1, 128], strides = [1, 1]} : vector<4x128xf32> to vector<1x128xf32>
    %16 = vector.broadcast %14 : vector<8x1xf32> to vector<8x128xf32>
    %17 = vector.broadcast %15 : vector<1x128xf32> to vector<8x128xf32>
    %18 = arith.mulf %16, %17 : vector<8x128xf32>
    %19 = arith.addf %11, %18 : vector<8x128xf32>
    %20 = vector.extract_strided_slice %12 {offsets = [0, 1], sizes = [8, 1], strides = [1, 1]} : vector<8x4xf32> to vector<8x1xf32>
    %21 = vector.extract_strided_slice %13 {offsets = [1, 0], sizes = [1, 128], strides = [1, 1]} : vector<4x128xf32> to vector<1x128xf32>
    %22 = vector.broadcast %20 : vector<8x1xf32> to vector<8x128xf32>
    %23 = vector.broadcast %21 : vector<1x128xf32> to vector<8x128xf32>
    %24 = arith.mulf %22, %23 : vector<8x128xf32>
    %25 = arith.addf %19, %24 : vector<8x128xf32>
    %26 = vector.extract_strided_slice %12 {offsets = [0, 2], sizes = [8, 1], strides = [1, 1]} : vector<8x4xf32> to vector<8x1xf32>
    %27 = vector.extract_strided_slice %13 {offsets = [2, 0], sizes = [1, 128], strides = [1, 1]} : vector<4x128xf32> to vector<1x128xf32>
    %28 = vector.broadcast %26 : vector<8x1xf32> to vector<8x128xf32>
    %29 = vector.broadcast %27 : vector<1x128xf32> to vector<8x128xf32>
    %30 = arith.mulf %28, %29 : vector<8x128xf32>
    %31 = arith.addf %25, %30 : vector<8x128xf32>
    %32 = vector.extract_strided_slice %12 {offsets = [0, 3], sizes = [8, 1], strides = [1, 1]} : vector<8x4xf32> to vector<8x1xf32>
    %33 = vector.extract_strided_slice %13 {offsets = [3, 0], sizes = [1, 128], strides = [1, 1]} : vector<4x128xf32> to vector<1x128xf32>
    %34 = vector.broadcast %32 : vector<8x1xf32> to vector<8x128xf32>
    %35 = vector.broadcast %33 : vector<1x128xf32> to vector<8x128xf32>
    %36 = arith.mulf %34, %35 : vector<8x128xf32>
    %37 = arith.addf %31, %36 : vector<8x128xf32>
    %c0_13 = arith.constant 0 : index
    %c0_14 = arith.constant 0 : index
    %38 = vector.load %arg7[%c0_13, %c0_14] : memref<1x128xf32, #tpu.memory_space<vmem>>, vector<1x128xf32>
    %39 = vector.broadcast %38 : vector<1x128xf32> to vector<8x128xf32>
    %40 = arith.addf %37, %39 : vector<8x128xf32>
    %cst_15 = arith.constant 0.000000e+00 : f32
    %41 = vector.broadcast %cst_15 : f32 to vector<8x128xf32>
    %42 = arith.maximumf %40, %41 : vector<8x128xf32>
    %c0_16 = arith.constant 0 : index
    %c0_17 = arith.constant 0 : index
    %43 = vector.load %arg8[%c0_16, %c0_17] : memref<1x128xf32, #tpu.memory_space<vmem>>, vector<1x128xf32>
    %44 = vector.broadcast %43 : vector<1x128xf32> to vector<8x128xf32>
    %45 = arith.mulf %42, %44 : vector<8x128xf32>
    %cst_18 = arith.constant dense<0.000000e+00> : vector<8xf32>
    %46 = vector.multi_reduction <add>, %45, %cst_18 [1] : vector<8x128xf32> to vector<8xf32>
    %47 = vector.shape_cast %46 : vector<8xf32> to vector<8x1xf32>
    %c0_19 = arith.constant 0 : index
    %c0_20 = arith.constant 0 : index
    %48 = memref.load %arg9[%c0_19, %c0_20] : memref<1x1xf32, #tpu.memory_space<smem>>
    %49 = vector.broadcast %48 : f32 to vector<8x1xf32>
    %50 = arith.addf %47, %49 : vector<8x1xf32>
    %c0_21 = arith.constant 0 : index
    %c0_22 = arith.constant 0 : index
    %51 = vector.load %arg10[%c0_21, %c0_22] : memref<8x1xf32, #tpu.memory_space<vmem>>, vector<8x1xf32>
    tpu.vector_store %arg10[%c0_21, %c0_22], %50 {strides = array<i32>} : memref<8x1xf32, #tpu.memory_space<vmem>>, vector<8x1xf32>,
    return
  }
  func.func @transform_0(%arg0: i32) -> (i32, i32) {
    %c0_i32 = arith.constant 0 : i32
    %c0_i32_0 = arith.constant 0 : i32
    return %arg0, %c0_i32 : i32, i32
  }
  func.func @transform_1(%arg0: i32) -> (i32, i32) {
    %c0_i32 = arith.constant 0 : i32
    %c0_i32_0 = arith.constant 0 : i32
    return %arg0, %c0_i32 : i32, i32
  }
  func.func @transform_2(%arg0: i32) -> (i32, i32) {
    %c0_i32 = arith.constant 0 : i32
    %c0_i32_0 = arith.constant 0 : i32
    %c0_i32_1 = arith.constant 0 : i32
    return %c0_i32, %c0_i32_0 : i32, i32
  }
  func.func @transform_3(%arg0: i32) -> (i32, i32) {
    %c0_i32 = arith.constant 0 : i32
    %c0_i32_0 = arith.constant 0 : i32
    %c0_i32_1 = arith.constant 0 : i32
    return %c0_i32, %c0_i32_0 : i32, i32
  }
  func.func @transform_4(%arg0: i32) -> (i32, i32) {
    %c0_i32 = arith.constant 0 : i32
    %c0_i32_0 = arith.constant 0 : i32
    %c0_i32_1 = arith.constant 0 : i32
    return %c0_i32, %c0_i32_0 : i32, i32
  }
  func.func @transform_5(%arg0: i32) -> (i32, i32) {
    %c0_i32 = arith.constant 0 : i32
    %c0_i32_0 = arith.constant 0 : i32
    %c0_i32_1 = arith.constant 0 : i32
    return %c0_i32, %c0_i32_0 : i32, i32
  }
  func.func @transform_6(%arg0: i32) -> (i32, i32) {
    %c0_i32 = arith.constant 0 : i32
    %c0_i32_0 = arith.constant 0 : i32
    %c0_i32_1 = arith.constant 0 : i32
    return %c0_i32, %c0_i32_0 : i32, i32
  }
  func.func @transform_7(%arg0: i32) -> (i32, i32) {
    %c0_i32 = arith.constant 0 : i32
    %c0_i32_0 = arith.constant 0 : i32
    %c0_i32_1 = arith.constant 0 : i32
    return %c0_i32, %c0_i32_0 : i32, i32
  }
  func.func @transform_8(%arg0: i32) -> (i32, i32) {
    %c0_i32 = arith.constant 0 : i32
    %c0_i32_0 = arith.constant 0 : i32
    %c0_i32_1 = arith.constant 0 : i32
    return %c0_i32, %c0_i32_0 : i32, i32
  }
  func.func @transform_9(%arg0: i32) -> (i32, i32) {
    %c0_i32 = arith.constant 0 : i32
    %c0_i32_0 = arith.constant 0 : i32
    return %arg0, %c0_i32 : i32, i32
  }
}

</mosaic_0001>

<bundles_post_ra>
// kernel: critic_forward.1
= control target key start
LH: loop header
LB: loop body
LE: loop exit
PB: predicated region body
PF: predicated region fallthrough
CT: control target
= control target key end

     0   :  { %vm82_vm0 = vcmask 1040384   ;;  %v454_v1 = vmov 0   ;;  %vm78_vm1 = vcmask 269312   ;;  %v455_v30 = vmov 2   ;;  %s595_s2 = inlined_call_operand.vmem [shape: bf16[33,256], index: 2, kind: input, shape index: {}]   ;;  %s596_s4 = inlined_call_operand.vmem [shape: bf16[256,128], index: 4, kind: input, shape index: {}]   ;;  %s597_s0 = inlined_call_operand.vmem [shape: f32[8,33], index: 0, kind: input, shape index: {}]   ;;  %s598_s1 = inlined_call_operand.vmem [shape: f32[8,4], index: 1, kind: input, shape index: {}]   ;;  %s599_s3 = inlined_call_operand.vmem [shape: f32[1,256], index: 3, kind: input, shape index: {}]   ;;  %s600_s5 = inlined_call_operand.vmem [shape: f32[4,128], index: 5, kind: input, shape index: {}]   ;;  %s601_s6 = inlined_call_operand.vmem [shape: f32[1,128], index: 6, kind: input, shape index: {}]   ;;  %s602_s7 = inlined_call_operand.vmem [shape: f32[1,128], index: 7, kind: input, shape index: {}]   ;;  %s603_s8 = inlined_call_operand.<no memory space> [shape: f32[1,1], index: 8, kind: input, shape index: {}]   ;;  %s604_s9 = inlined_call_operand.vmem [shape: f32[8,1], index: 9, kind: output, shape index: {}]  }
   0x1   :  { %v40_v0 = vld [vmem:[%s595_s2 + $0x20] sm:$0x11]  ;;  %v84_v2 = vsel %vm82_vm0, 65535, %v454_v1  ;;  %123 = vmatprep.mubr.bf16.mxu0 %v454_v1  ;;  %425 = vset.pattern.permute.xlu0 %v454_v1  ;;  %v432_v7 = vld [vmem:[%s595_s2 + $0x14] ss:$8 sps:$4 sm:$0xff]   ;;  %v442_v14 = vld [vmem:[%s596_s4 + $0x68] sm:$0xff]   ;;  %v43_v33 = vlaneseq }
   0x2   :  { %v379_v3 = vcombine.high %v40_v0, %v40_v0  ;;  %v378_v4 = vcombine.low %v40_v0, %v40_v0  ;;  %v434_v8 = vld [vmem:[%s595_s2 + $0x10] ss:$8 sps:$4 sm:$0xff]   ;;  %v435_v10 = vld [vmem:[%s595_s2 + $0x4] ss:$8 sps:$4 sm:$0xff]   ;;  %v437_v15 = vld [vmem:[%s595_s2] ss:$8 sps:$4 sm:$0xff]   ;;  %427 = vset.pattern.permute.xlu1 %v455_v30 }
   0x3   :  { %v438_v9 = vld [vmem:[%s596_s4 + $0x78] sm:$0xff]   ;;  %v440_v12 = vld [vmem:[%s596_s4 + $0x70] sm:$0xff]   ;;  %v34_v16 = vld [vmem:[%s597_s0] sm:$0xff]  ;;  %v456_v31 = vmov 1   ;;  %v457_v32 = vmov 3   ;;  %v44_v34 = vshrl.u32 %v43_v33, 7 }
   0x4   :  { %v89_v5 = vand.u32 %v379_v3, %v84_v2  ;;  %v86_v6 = vand.u32 %v378_v4, %v84_v2  ;;  %v439_v11 = vld [vmem:[%s596_s4 + $0x38] sm:$0xff]   ;;  %399 = vmatprep.subr.bf16.mxu1 %v438_v9  ;;  %v441_v13 = vld [vmem:[%s596_s4 + $0x30] sm:$0xff]   ;;  %v443_v17 = vld [vmem:[%s596_s4 + $0x28] sm:$0xff]   ;;  %v35_v19 = vpack.c.bf16 %v34_v16, %v34_v16  ;;  %vm368_vm2 = vcmask 7168  }
   0x5   :  { %400 = vmatpush3.bf16.msra.mxu1 %v439_v11  ;;  %v444_v18 = vld [vmem:[%s596_s4 + $0x60] sm:$0xff]   ;;  %v446_v21 = vld [vmem:[%s596_s4 + $0x58] sm:$0xff]   ;;  %v448_v23 = vld [vmem:[%s596_s4 + $0x50] sm:$0xff]   ;;  %v45_v35 = vsub.s32 0, %v44_v34  ;;  %v49_v37 = vsub.s32 1, %v44_v34  ;;  %v332_v54 = vsub.s32 2, %v44_v34 }
   0x6   :  { %101 = vmatprep.subr.bf16.mxu0 %v89_v5  ;;  %401 = vmatprep.subr.bf16.mxu1 %v440_v12  ;;  %v445_v20 = vld [vmem:[%s596_s4 + $0x20] sm:$0xff]   ;;  %v447_v22 = vld [vmem:[%s596_s4 + $0x18] sm:$0xff]   ;;  %v449_v24 = vld [vmem:[%s596_s4 + $0x10] sm:$0xff]   ;;  %v342_v56 = vsub.s32 3, %v44_v34 }
   0x7   :  { %102 = vmatpush1.bf16.msra.mxu0 %v86_v6  ;;  %v450_v25 = vld [vmem:[%s596_s4 + $0x48] sm:$0xff]   ;;  %v452_v27 = vld [vmem:[%s596_s4 + $0x40] sm:$0xff]  }
   0x8   :  { %103 = vmatprep.subr.bf16.mxu0 %v432_v7  ;;  %v451_v26 = vld [vmem:[%s596_s4 + $0x8] sm:$0xff]   ;;  %v453_v28 = vld [vmem:[%s596_s4] sm:$0xff]  }
   0x9   :  { %402 = vmatpush3.bf16.msra.mxu1 %v441_v13  ;;  %v168_v29 = vld [vmem:[%s598_s1] sm:$0xff] }
   0xa   :  { %403 = vmatprep.subr.bf16.mxu1 %v442_v14  ;;  %172 = vperm.xlu0 %425, %v168_v29   ;;  %v41_v36 = vld [vmem:[%s599_s3] sm:$0x3] }
   0xb   :  { %104 = vmatpush1.bf16.msra.mxu0 %v434_v8  ;;  %327 = vperm.xlu1 %427, %v168_v29   ;;  %v46_v38 = vrot.slane %v41_v36, %v45_v35  ;;  %v50_v39 = vrot.slane %v41_v36, %v49_v37  ;;  %v169_v51 = vld [vmem:[%s600_s5] sm:$0xf] }
   0xc   :  { %105 = vmatprep.subr.bf16.mxu0 %v435_v10  ;;  %v178_v52 = vrot.slane %v169_v51, %v45_v35  ;;  %v323_v55 = vrot.slane %v169_v51, %v49_v37  ;;  %v333_v62 = vrot.slane %v169_v51, %v332_v54  ;;  %v343_v0 = vrot.slane %v169_v51, %v342_v56  ;;  %v397_v9 = vld [vmem:[%s601_s6] ss:$0 sm:$0xff] }
   0xd   :  { %404 = vmatpush3.bf16.msra.mxu1 %v443_v17  ;;  %v398_v12 = vld [vmem:[%s602_s7] ss:$0 sm:$0xff] }
   0xe   :  { %405 = vmatprep.subr.bf16.mxu1 %v444_v18  ;;  %426 = vset.pattern.permute.xlu0 %v456_v31 }
   0xf   :  { %106 = vmatpush1.bf16.msra.mxu0 %v437_v15  ;;  %428 = vset.pattern.permute.xlu1 %v457_v32  ;;  %v366_v15 = vstv %s603_s8 }
  0x10   :  { %317 = vperm.xlu0 %426, %v168_v29   ;;  %337 = vperm.xlu1 %428, %v168_v29  }
  0x11   :  { %406 = vmatpush3.bf16.msra.mxu1 %v445_v20 }
  0x12   :  { %380 = vmatmul.mubr.msk.bf16.vlgmr.msra.gmra.mxu0 %vm78_vm1, %v35_v19  ;;  %407 = vmatprep.subr.bf16.mxu1 %v446_v21 }
  0x14   :  { %429 = vset.pattern.permute.xlu0 %v457_v32 }
  0x15   :  { %408 = vmatpush3.bf16.msra.mxu1 %v447_v22 }
  0x16   :  { %409 = vmatprep.subr.bf16.mxu1 %v448_v23 }
  0x19   :  { %410 = vmatpush3.bf16.msra.mxu1 %v449_v24 }
  0x1a   :  { %411 = vmatprep.subr.bf16.mxu1 %v450_v25 }
  0x1d   :  { %412 = vmatpush3.bf16.msra.mxu1 %v451_v26 }
  0x1e   :  { %413 = vmatprep.subr.bf16.mxu1 %v452_v27 }
  0x21   :  { %414 = vmatpush3.bf16.msra.mxu1 %v453_v28 }
  0x85   :  { %v173_v50 = vpop.permute.xlu0 %172 }
  0x86   :  { %v328_v53 = vpop.permute.xlu1 %327  ;;  %v179_v59 = vmul.f32 %v178_v52, %v173_v50 }
  0x87   :  { %v334_v5 = vmul.f32 %v333_v62, %v328_v53 }
  0x8b   :  { %v318_v58 = vpop.permute.xlu0 %317  ;;  %v338_v2 = vpop.permute.xlu1 %337 }
  0x8c   :  { %v324_v63 = vmul.f32 %v323_v55, %v318_v58  ;;  %v344_v7 = vmul.f32 %v343_v0, %v338_v2 }
  0xd2   :  { %v125_v40 = vpop.f32.mrf.mxu0 }
  0xd3   :  { %v126_v41 = vadd.f32 %v125_v40, %v46_v38 }
  0xd4   :  { %v127_v42 = vpop.f32.mrf.mxu0 }
  0xd5   :  { %v128_v43 = vadd.f32 %v127_v42, %v50_v39  ;;  %v132_v44 = vmax.f32 %v126_v41, 0.0 }
  0xd6   :  { %v129_v45 = vpop.f32.mrf.mxu0 }
  0xd7   :  { %v133_v46 = vmax.f32 %v128_v43, 0.0  ;;  %v134_v49 = vpack.c.bf16 %v132_v44, %v132_v44 }
  0xd8   :  { %v130_v47 = vpop.f32.mrf.mxu0 }
  0xd9   :  { %v135_v48 = vpack.c.bf16 %v133_v46, %v133_v46 }
  0xdb   :  { %308 = vmatprep.mubr.bf16.mxu1 %v135_v48 }
  0xdc   :  { %309 = vmatmul.mubr.bf16.vlgmr.msra.gmra.mxu1 %v134_v49 }
 0x19c   :  { %v415_v57 = vpop.f32.mrf.mxu1 }
 0x19e   :  { %v416_v60 = vpop.f32.mrf.mxu1 }
 0x19f   :  { %v417_v61 = vadd.f32 %v416_v60, %v415_v57 }
 0x1a0   :  { %v418_v1 = vpop.f32.mrf.mxu1 }
 0x1a1   :  { %v311_v3 = vadd.f32 %v417_v61, %v179_v59 }
 0x1a2   :  { %v419_v4 = vpop.f32.mrf.mxu1 }
 0x1a3   :  { %v325_v6 = vadd.f32 %v324_v63, %v311_v3 }
 0x1a5   :  { %v335_v8 = vadd.f32 %v334_v5, %v325_v6 }
 0x1a7   :  { %v345_v10 = vadd.f32 %v344_v7, %v335_v8 }
 0x1a9   :  { %v353_v11 = vadd.f32 %v397_v9, %v345_v10 }
 0x1ab   :  { %v354_v13 = vmax.f32 %v353_v11, 0.0 }
 0x1ad   :  { %v362_v14 = vmul.f32 %v398_v12, %v354_v13 }
 0x1af   :  { %363 = vadd.xlane.f32.xlu1 %v362_v14 }
 0x238   :  { %v364_v16 = vpop.xlane.xlu1 %363 }
 0x239   :  { %v367_v17 = vadd.f32 %v366_v15, %v364_v16 }
 0x23b   :  { %369 = vst.msk [vmem:[%s604_s9] sm:$0xff] %vm368_vm2, %v367_v17 }

</bundles_post_ra>
